<compile_context>
chip_gen: v7x
topology: tpu7x:2x2x1
jax: 0.10.0
libtpu: 0.0.40
codegen_flags: <defaults>
</compile_context>

<pallas_src>
import functools

import jax
import jax.numpy as jnp
from jax.experimental import pallas as pl
from jax.experimental.pallas import tpu as pltpu


def _cdiv(a, b):
    return -(-a // b)


def _conv1d_eventually_kernel(x_ref, w_ref, omb_ref, o_ref, *, kernel_size):
    """One (tile_b, tile_c, L) slab -> stride-1 depthwise conv + relu(1 - beta + conv)."""
    x = x_ref[...]                           # (TB, TC, L)  — single load of the slab
    w = w_ref[...]                           # (TC, K)      — hoisted, loop-invariant
    n1 = x.shape[-1] - kernel_size + 1       # stride-1 window count

    # Tap 0, then K-1 statically shifted lane slices (K is small & static -> unrolled).
    acc = x[:, :, :n1] * w[:, 0:1][None]     # (1,TC,1) weight broadcast over lanes
    for k in range(1, kernel_size):
        acc = acc + x[:, :, k:k + n1] * w[:, k:k + 1][None]

    # out = relu(1 - beta + conv). LeakyReLU(0.02) applied to a ReLU output is the
    # identity, so it is intentionally dropped (dead compute per perf review).
    o_ref[...] = jnp.maximum(acc + omb_ref[...][None], 0.0)


def _choose_tile_c(C):
    if C <= 8:
        return C                             # full dim (allowed even when < 8 sublanes)
    return min((C // 8) * 8, 64)             # sublane-aligned channel tile


def conv1d_eventually_forward(x, weights, beta, *, step=1,
                              vmem_budget_bytes=32 * 1024 * 1024):
    """x: (B, C, L); weights: (C, K); beta: (C,) -> (B, C, (L-K)//step + 1) float32."""
    B, C, L = x.shape
    Cw, K = weights.shape
    assert Cw == C and beta.shape == (C,)
    assert L >= K >= 1
    n_win = (L - K) // step + 1
    n1 = L - K + 1                           # stride-1 window count computed in-kernel

    xf = x.astype(jnp.float32)
    wf = weights.astype(jnp.float32)
    omb = (1.0 - beta.astype(jnp.float32)).reshape(C, 1)   # fold "1 - beta" once

    # --- tiling ------------------------------------------------------------------
    tile_c = _choose_tile_c(C)
    # Double-buffered x + out footprint per batch row of a block (bytes).
    per_b_bytes = 2 * 4 * tile_c * (L + n1)
    tile_b = max(1, min(B, vmem_budget_bytes // max(per_b_bytes, 1)))
    # v7x megacore / pipelining: guarantee >= 2 grid steps when the batch can be split.
    if _cdiv(C, tile_c) * _cdiv(B, tile_b) < 2 and B >= 2:
        tile_b = _cdiv(B, 2)
    grid = (_cdiv(C, tile_c), _cdiv(B, tile_b))   # C-tiles outer so weight blocks are reused

    working_set = 2 * 4 * (tile_b * tile_c * (L + n1) + tile_c * (K + 1))
    cp_kwargs = dict(dimension_semantics=("parallel", "parallel"))
    if working_set > 12 * 1024 * 1024:       # only raise when default scoped VMEM is tight
        cp_kwargs["vmem_limit_bytes"] = min(working_set + (8 << 20), 100 << 20)

    out = pl.pallas_call(
        functools.partial(_conv1d_eventually_kernel, kernel_size=K),
        out_shape=jax.ShapeDtypeStruct((B, C, n1), jnp.float32),
        grid_spec=pltpu.PrefetchScalarGridSpec(
            num_scalar_prefetch=0,
            grid=grid,
            in_specs=[
                pl.BlockSpec((tile_b, tile_c, L), lambda cj, bi: (bi, cj, 0)),  # x slab
                pl.BlockSpec((tile_c, K), lambda cj, bi: (cj, 0)),              # weights
                pl.BlockSpec((tile_c, 1), lambda cj, bi: (cj, 0)),              # 1 - beta
            ],
            out_specs=pl.BlockSpec((tile_b, tile_c, n1), lambda cj, bi: (bi, cj, 0)),
        ),
        compiler_params=pltpu.CompilerParams(**cp_kwargs),
        cost_estimate=pl.CostEstimate(
            flops=2 * B * C * n1 * K,
            transcendentals=0,
            bytes_accessed=4 * (B * C * L + B * C * n1 + C * K + C),
        ),
    )(xf, wf, omb)

    if step > 1:
        out = out[:, :, ::step]              # lane-dense subsample outside the kernel
    return out[:, :, :n_win]


def _reference(x, weights, beta, step=1):
    B, C, L = x.shape
    K = weights.shape[1]
    n_win = (L - K) // step + 1
    idx = jnp.arange(n_win)[:, None] * step + jnp.arange(K)[None, :]   # (n_win, K)
    windows = x[:, :, idx]                                             # (B, C, n_win, K)
    conv = jnp.einsum("bcwk,ck->bcw", windows, weights)
    r = jnp.maximum(1.0 - beta[None, :, None] + conv, 0.0)
    return jnp.where(r >= 0.0, r, 0.02 * r)                            # leaky_relu (no-op)


if __name__ == "__main__":
    key = jax.random.PRNGKey(0)
    k1, k2, k3, k4, k5, k6 = jax.random.split(key, 6)

    # Case 1: small module-like shapes, step=1 (C < 8 path, forced 2-step grid).
    B, C, L, K = 2, 4, 16, 3
    x = jax.random.normal(k1, (B, C, L), dtype=jnp.float32)
    w = jax.random.normal(k2, (C, K), dtype=jnp.float32)     # nn.Parameter(randn(C, K))
    beta = jax.random.normal(k3, (C,), dtype=jnp.float32)    # nn.Parameter(randn(C))
    out = jax.block_until_ready(conv1d_eventually_forward(x, w, beta, step=1))
    ref = _reference(x, w, beta, step=1)
    assert out.shape == (B, C, L - K + 1), out.shape
    assert jnp.allclose(out, ref, atol=1e-5, rtol=1e-5), "case 1 mismatch vs reference"

    # Case 2: C multiple of 8, partial batch edge block, step > 1.
    B2, C2, L2, K2, S2 = 3, 8, 40, 5, 2
    x2 = jax.random.normal(k4, (B2, C2, L2), dtype=jnp.float32)
    w2 = jax.random.normal(k5, (C2, K2), dtype=jnp.float32)
    b2 = jax.random.normal(k6, (C2,), dtype=jnp.float32)
    out2 = jax.block_until_ready(conv1d_eventually_forward(x2, w2, b2, step=S2))
    ref2 = _reference(x2, w2, b2, step=S2)
    assert out2.shape == ((B2, C2, (L2 - K2) // S2 + 1)), out2.shape
    assert jnp.allclose(out2, ref2, atol=1e-5, rtol=1e-5), "case 2 mismatch vs reference"

    print("KERNEL_OK")
</pallas_src>

<mosaic_0001>
module attributes {stable_mosaic.version = 11 : i64} {
  func.func @_conv1d_eventually_kernel(%arg0: i32, %arg1: i32, %arg2: memref<1x4x16xf32, #tpu.memory_space<vmem>>, %arg3: memref<4x3xf32, #tpu.memory_space<vmem>>, %arg4: memref<4x1xf32, #tpu.memory_space<vmem>>, %arg5: memref<1x4x14xf32, #tpu.memory_space<vmem>>) attributes {dimension_semantics = [#tpu.dimension_semantics<parallel>, #tpu.dimension_semantics<parallel>], iteration_bounds = array<i64: 1, 2>, scalar_prefetch = 0 : i64, scratch_operands = 0 : i64, tpu.core_type = #tpu.core_type<tc>, window_params = [{transform_indices = @transform_0, window_bounds = array<i64: 1, 4, 16>}, {transform_indices = @transform_1, window_bounds = array<i64: 4, 3>}, {transform_indices = @transform_2, window_bounds = array<i64: 4, 1>}, {transform_indices = @transform_3, window_bounds = array<i64: 1, 4, 14>}]} {
    %c0 = arith.constant 0 : index
    %c0_0 = arith.constant 0 : index
    %c0_1 = arith.constant 0 : index
    %0 = vector.load %arg2[%c0, %c0_0, %c0_1] : memref<1x4x16xf32, #tpu.memory_space<vmem>>, vector<1x4x16xf32>
    %c0_2 = arith.constant 0 : index
    %c0_3 = arith.constant 0 : index
    %1 = vector.load %arg3[%c0_2, %c0_3] : memref<4x3xf32, #tpu.memory_space<vmem>>, vector<4x3xf32>
    %2 = vector.extract_strided_slice %0 {offsets = [0, 0, 0], sizes = [1, 4, 14], strides = [1, 1, 1]} : vector<1x4x16xf32> to vector<1x4x14xf32>
    %3 = vector.extract_strided_slice %1 {offsets = [0, 0], sizes = [4, 1], strides = [1, 1]} : vector<4x3xf32> to vector<4x1xf32>
    %4 = vector.shape_cast %3 : vector<4x1xf32> to vector<1x4x1xf32>
    %5 = vector.broadcast %4 : vector<1x4x1xf32> to vector<1x4x14xf32>
    %6 = arith.mulf %2, %5 : vector<1x4x14xf32>
    %7 = vector.extract_strided_slice %0 {offsets = [0, 0, 1], sizes = [1, 4, 14], strides = [1, 1, 1]} : vector<1x4x16xf32> to vector<1x4x14xf32>
    %8 = vector.extract_strided_slice %1 {offsets = [0, 1], sizes = [4, 1], strides = [1, 1]} : vector<4x3xf32> to vector<4x1xf32>
    %9 = vector.shape_cast %8 : vector<4x1xf32> to vector<1x4x1xf32>
    %10 = vector.broadcast %9 : vector<1x4x1xf32> to vector<1x4x14xf32>
    %11 = arith.mulf %7, %10 : vector<1x4x14xf32>
    %12 = arith.addf %6, %11 : vector<1x4x14xf32>
    %13 = vector.extract_strided_slice %0 {offsets = [0, 0, 2], sizes = [1, 4, 14], strides = [1, 1, 1]} : vector<1x4x16xf32> to vector<1x4x14xf32>
    %14 = vector.extract_strided_slice %1 {offsets = [0, 2], sizes = [4, 1], strides = [1, 1]} : vector<4x3xf32> to vector<4x1xf32>
    %15 = vector.shape_cast %14 : vector<4x1xf32> to vector<1x4x1xf32>
    %16 = vector.broadcast %15 : vector<1x4x1xf32> to vector<1x4x14xf32>
    %17 = arith.mulf %13, %16 : vector<1x4x14xf32>
    %18 = arith.addf %12, %17 : vector<1x4x14xf32>
    %c0_4 = arith.constant 0 : index
    %c0_5 = arith.constant 0 : index
    %19 = vector.load %arg4[%c0_4, %c0_5] : memref<4x1xf32, #tpu.memory_space<vmem>>, vector<4x1xf32>
    %20 = vector.shape_cast %19 : vector<4x1xf32> to vector<1x4x1xf32>
    %21 = vector.broadcast %20 : vector<1x4x1xf32> to vector<1x4x14xf32>
    %22 = arith.addf %18, %21 : vector<1x4x14xf32>
    %cst = arith.constant 0.000000e+00 : f32
    %23 = vector.broadcast %cst : f32 to vector<1x4x14xf32>
    %24 = arith.maximumf %22, %23 : vector<1x4x14xf32>
    %c0_6 = arith.constant 0 : index
    %c0_7 = arith.constant 0 : index
    %c0_8 = arith.constant 0 : index
    %25 = vector.load %arg5[%c0_6, %c0_7, %c0_8] : memref<1x4x14xf32, #tpu.memory_space<vmem>>, vector<1x4x14xf32>
    tpu.vector_store %arg5[%c0_6, %c0_7, %c0_8], %24 {strides = array<i32>} : memref<1x4x14xf32, #tpu.memory_space<vmem>>, vector<1x4x14xf32>,
    return
  }
  func.func @transform_0(%arg0: i32, %arg1: i32) -> (i32, i32, i32) {
    %c0_i32 = arith.constant 0 : i32
    %c0_i32_0 = arith.constant 0 : i32
    return %arg1, %arg0, %c0_i32 : i32, i32, i32
  }
  func.func @transform_1(%arg0: i32, %arg1: i32) -> (i32, i32) {
    %c0_i32 = arith.constant 0 : i32
    %c0_i32_0 = arith.constant 0 : i32
    return %arg0, %c0_i32 : i32, i32
  }
  func.func @transform_2(%arg0: i32, %arg1: i32) -> (i32, i32) {
    %c0_i32 = arith.constant 0 : i32
    %c0_i32_0 = arith.constant 0 : i32
    return %arg0, %c0_i32 : i32, i32
  }
  func.func @transform_3(%arg0: i32, %arg1: i32) -> (i32, i32, i32) {
    %c0_i32 = arith.constant 0 : i32
    %c0_i32_0 = arith.constant 0 : i32
    return %arg1, %arg0, %c0_i32 : i32, i32, i32
  }
}

</mosaic_0001>

<bundles_post_ra>
// kernel: tpu_custom_call.1
= control target key start
LH: loop header
LB: loop body
LE: loop exit
PB: predicated region body
PF: predicated region fallthrough
CT: control target
= control target key end

     0   :  { %8 = vsyncpa [#allocation3], 0  ;;  %s809_s0 = inlined_call_operand.hbm [shape: f32[2,4,16], index: 0, kind: input, shape index: {}]   ;;  %s810_s1 = inlined_call_operand.vmem [shape: f32[4,3], index: 1, kind: input, shape index: {}]   ;;  %s811_s2 = inlined_call_operand.vmem [shape: f32[4,1], index: 2, kind: input, shape index: {}]   ;;  %s812_s3 = inlined_call_operand.hbm [shape: f32[2,4,14], index: 3, kind: output, shape index: {}]  }
   0x1   :  { %10 = vsyncpa [#allocation3 + $0x1], 0 }
   0x2   :  { %11 = vsyncpa [#allocation4], 0 }
   0x3   :  { %13 = vsyncpa [#allocation4 + $0x1], 0  ;;  %s627_s12 = smov 0   ;;  %s629_s13 = smov 0  }
   0x4   :  { %s631_s14 = smov 0   ;;  %s633_s15 = smov 0  }
   0x5   :  { %s635_s16 = smov 0   ;;  %s637_s17 = smov 0  }
   0x6 LB: > { %s400_s18 = sadd.s32 4294967295, %s598_s17   ;;  %s401_s19 = sadd.s32 4294967294, %s598_s17   ;;  %s598_s17 = sphi %s637_s17, %s19_s17   ;;  %s594_s16 = sphi %s635_s16, %s828_s16   ;;  %s590_s15 = sphi %s633_s15, %s827_s15   ;;  %s586_s14 = sphi %s631_s14, %s826_s14   ;;  %s582_s13 = sphi %s629_s13, %s825_s13   ;;  %s578_s12 = sphi %s627_s12, %s824_s12  }
   0x7   : > { %s28_s20 = sadd.s32 1, %s594_s16  ;;  %s40_s21 = sadd.s32 1, %s586_s14 }
   0x8   : > { %p29_p0 = scmp.ge.s32.totalorder %s28_s20, 2  ;;  %p47_p1 = scmp.ne.s32.totalorder %s586_s14, %s582_s13 }
   0x9   : > { %p48_p2 = scmp.eq.s32.totalorder %s598_s17, 0  ;;  %p53_p3 = scmp.ne.s32.totalorder %s582_s13, %s578_s12 }
   0xa   : > { %s830_s20 = smov (%p29_p0, %s28_s20), 0  ;;  %p54_p5 = scmp.eq.s32.totalorder %s400_s18, 0 }
   0xb   : > { %p668_p4 = por %p48_p2, %p47_p1  ;;  %s35_s23 = ssub.s32 %s594_s16, %s830_s20 }
   0xc   : > { %p131_p6 = scmp.eq.s32.totalorder %s400_s18, 1  ;;  %p38_p7 = scmp.eq.s32.totalorder %s35_s23, 0 }
   0xd   : > { %p674_p8 = por %p54_p5, %p53_p3  ;;  %p137_p10 = scmp.eq.s32.totalorder %s401_s19, 1 }
   0xe   : > { %p678_p9 = por %p131_p6, %p47_p1  ;;  %p427_p13 = scmp.lt.s32.totalorder %s598_s17, 2 }
   0xf   : > { %s683_s26 = scalar_select %p38_p7, %s586_s14, %s40_s21  }
  0x10   : > { %s816_s25 = scalar_select %p678_p9, 1, 0 }
  0x11   : > { %p685_p11 = por %p137_p10, %p53_p3  ;;  %s171_s28 = sand.u32 1, %s586_s14  }
  0x12   : > { %s406_s29 = sshll.u32 %s171_s28, 2  ;;  %s407_s30 = sshll.u32 %s594_s16, 6 }
  0x13   : > { %s817_s27 = scalar_select %p685_p11, 1, 0 }
  0x14   : > { %s696_s6 = scalar_lea.hbm %s809_s0, %s407_s30  ;;  %s175_s7 = scalar_lea.vmem [#allocation2], %s406_s29 }
  0x15   : > { %s183_s8 = sshll.u32 %s175_s7, 4  ;;  %p702_p0 = pnand %p427_p13, %p668_p4  ;;  %s698_s8 = int_to_ptr.vmem [resolvable:$true] %s183_s8 }
  0x16   : > { %s172_s10 = scalar_lea.sflag [#allocation3], %s171_s28  ;;  %s486_s11 = scalar_lea.hbm %s696_s6, 64 }
  0x17   : > { %p487_p3 = scmp.ne.s32.totalorder %s696_s6, %s486_s11  ;;  %p488_p5 = pneg %p702_p0 }
  0x18   : > { %s491_s21 = scalar_lea.hbm %s809_s0, 128  ;;  %p492_p4 = scmp.lt.u32.totalorder %s696_s6, %s809_s0 }
  0x19   : > { %p489_p6 = pnand %p488_p5, %p487_p3  ;;  %p493_p10 = scmp.lt.u32.totalorder %s491_s21, %s486_s11 }
  0x1a   : > { %p495_p12 = scmp.lt.u32.totalorder %s486_s11, %s696_s6 }
  0x1b   : > { %p490_p7 = pneg %p489_p6  ;;  %p494_p13 = por %p493_p10, %p492_p4 }
  0x1d   : > { %p496_p1 = por %p495_p12, %p494_p13 }
  0x1f   : > { %p497_p2 = pnand %p496_p1, %p490_p7 }
  0x21   : > { %500 = shalt.err (!%p497_p2)
}
  0x22   : > { %s501_s28 = scalar_lea.vmem %s698_s8, 64  ;;  %s600_s29 = smov [#allocation2]  }
  0x23   : > { %p502_p3 = scmp.ne.s32.totalorder %s698_s8, %s501_s28  ;;  %s506_s30 = sshll.u32 %s600_s29, 4  ;;  %s507_s30 = int_to_ptr.vmem [resolvable:$false] %s506_s30 }
  0x24   : > { %s508_s4 = scalar_lea.vmem %s507_s30, 128  ;;  %p509_p9 = scmp.lt.s32.totalorder %s698_s8, %s507_s30 }
  0x25   : > { %p504_p6 = pnand %p502_p3, %p488_p5  ;;  %p510_p4 = scmp.lt.s32.totalorder %s508_s4, %s501_s28 }
  0x27   : > { %p505_p11 = pneg %p504_p6  ;;  %p511_p10 = por %p510_p4, %p509_p9 }
  0x29   : > { %p512_p12 = pnand %p511_p10, %p505_p11 }
  0x2b   : > { %515 = shalt.err (!%p512_p12)
}
  0x2c   : > { %422 = dma.hbm_to_vmem [thread:$0]  (!%p702_p0), %s696_s6, 64, %s698_s8, %s172_s10  }
  0x2d   : > { %p819_p1 = scmp.lt.s32.totalorder %s598_s17, 3  ;;  %p820_p2 = scmp.ge.s32.totalorder %s598_s17, 1 }
  0x2f   : > { %p189_p5 = pnand %p820_p2, %p819_p1 }
  0x30   : > { %s738_s5 = sand.u32 (!%p189_p5), 1, %s582_s13  }
  0x31   : > { %192 = sbr.rel (%p189_p5) target bundleno = 329 (0x149), region = 32  ;;  %s409_s7 = sshll.u32 (!%p189_p5), %s738_s5, 2 }
  0x32   : > { %s195_s11 = scalar_lea.sflag (!%p189_p5), [#allocation3], %s738_s5  ;;  %s198_s9 = scalar_lea.vmem (!%p189_p5), [#allocation2], %s409_s7 }
  0x38   : > { %569 = dma.done.wait (%p674_p8), %s195_s11, 64  }
  0x39   : > { %571 = vsyncadd (%p674_p8), %s195_s11, 4294967232  ;;  %v601_v0 = vmov 1   ;;  %v602_v1 = vmov 0   ;;  %v238_v2 = vld [vmem:[%s810_s1] sm:$0xf]  ;;  %v603_v4 = vmov 2  }
  0x3a   : > { %482 = vset.pattern.permute.xlu0 %v601_v0  ;;  %484 = vset.pattern.permute.xlu1 %v602_v1  ;;  %v265_v3 = vld [vmem:[%s811_s2] sm:$0xf]  ;;  %s604_s24 = smov 127   ;;  %s605_s19 = smov 126   ;;  %vm273_vm0 = vcmask 109568  }
  0x3b   : > { %246 = vperm.xlu0 %482, %v238_v2   ;;  %241 = vperm.xlu1 %484, %v238_v2   ;;  %v237_v5 = vld [vmem:[%s198_s9] sm:$0xf]  ;;  %s412_s21 = sshll.u32 %s590_s15, 6  ;;  %s228_s22 = scalar_lea.vmem [#allocation5], %s409_s7 }
  0x3c   : > { %s290_s23 = sshll.u32 %s228_s22, 4  ;;  %s760_s30 = scalar_lea.hbm %s812_s3, %s412_s21  ;;  %s762_s23 = int_to_ptr.vmem [resolvable:$true] %s290_s23 }
  0x3d   : > { %s276_s4 = scalar_lea.sflag [#allocation4], %s738_s5  ;;  %s516_s11 = scalar_lea.vmem %s762_s23, 64 }
  0x3e   : > { %p517_p8 = scmp.ne.s32.totalorder %s762_s23, %s516_s11  ;;  %p821_p9 = scmp.ne.s32.totalorder %s816_s25, 0 }
  0x3f   : > { %483 = vset.pattern.permute.xlu0 %v603_v4  ;;  %268 = vperm.xlu1 %484, %v265_v3   ;;  %s606_s15 = smov [#allocation5]  }
  0x40   : > { %256 = vperm.xlu0 %483, %v238_v2   ;;  %p518_p11 = pnand %p517_p8, %p821_p9  ;;  %s520_s7 = sshll.u32 %s606_s15, 4  ;;  %s521_s7 = int_to_ptr.vmem [resolvable:$false] %s520_s7 }
  0x41   : > { %s522_s9 = scalar_lea.vmem %s521_s7, 128  ;;  %p523_p7 = scmp.lt.s32.totalorder %s762_s23, %s521_s7 }
  0x42   : > { %p519_p0 = pneg %p518_p11  ;;  %p524_p13 = scmp.lt.s32.totalorder %s522_s9, %s516_s11 }
  0x44   : > { %485 = vset.pattern.permute.xlu0 %v602_v1  ;;  %p525_p3 = por %p524_p13, %p523_p7 }
  0x46   : > { %p526_p6 = pnand %p525_p3, %p519_p0 }
  0xba   : > { %v247_v6 = vpop.permute.xlu0 %246  ;;  %v242_v10 = vpop.permute.xlu1 %241 }
  0xbb   : > { %v249_v7 = vmul.f32 %v247_v6, %v237_v5  ;;  %v244_v13 = vmul.f32 %v242_v10, %v237_v5 }
  0xbd   : > { %251 = vrot.lane.b32.xlu1 %v249_v7, %s604_s24 }
  0xbe   : > { %v269_v11 = vpop.permute.xlu1 %268 }
  0xbf   : > { %v257_v8 = vpop.permute.xlu0 %256 }
  0xc0   : > { %v259_v9 = vmul.f32 %v257_v8, %v237_v5 }
  0xc2   : > { %261 = vrot.lane.b32.xlu0 %v259_v9, %s605_s19 }
 0x12f   : > { %v252_v12 = vpop.permute.xlu1 %251 }
 0x130   : > { %v254_v14 = vadd.f32 %v252_v12, %v244_v13 }
 0x134   : > { %v262_v15 = vpop.permute.xlu0 %261 }
 0x135   : > { %v264_v16 = vadd.f32 %v262_v15, %v254_v14 }
 0x137   : > { %v271_v17 = vadd.f32 %v269_v11, %v264_v16 }
 0x139   : > { %v272_v18 = vmax.f32 %v271_v17, 0.0 }
 0x13b   : > { %274 = vst.msk [vmem:[%s228_s22] sm:$0xf] %vm273_vm0, %v272_v18 }
 0x13c   : > { %529 = shalt.err (!%p526_p6)
}
 0x13d   : > { %s530_s5 = scalar_lea.hbm %s760_s30, 64  ;;  %s534_s10 = scalar_lea.hbm %s812_s3, 128 }
 0x13e   : > { %p531_p4 = scmp.ne.s32.totalorder %s760_s30, %s530_s5  ;;  %p535_p1 = scmp.lt.u32.totalorder %s760_s30, %s812_s3 }
 0x13f   : > { %p536_p2 = scmp.lt.u32.totalorder %s534_s10, %s530_s5  ;;  %p538_p8 = scmp.lt.u32.totalorder %s530_s5, %s760_s30 }
 0x140   : > { %p532_p10 = pnand %p531_p4, %p821_p9 }
 0x141   : > { %p537_p5 = por %p536_p2, %p535_p1 }
 0x142   : > { %p533_p12 = pneg %p532_p10 }
 0x143   : > { %p539_p11 = por %p538_p8, %p537_p5 }
 0x145   : > { %p540_p0 = pnand %p539_p11, %p533_p12 }
 0x147   : > { %543 = shalt.err (!%p540_p0)
}
 0x148   : > { %417 = dma.vmem_to_hbm [thread:$0]  (%p821_p9), %s762_s23, 64, %s760_s30, %s276_s4  }
 0x149 PF: > { %s302_s19 = sand.u32 1, %s578_s12   ;;  %p822_p7 = scmp.ne.s32.totalorder %s817_s27, 0 }
 0x14a   : > { %p823_p13 = scmp.ge.s32.totalorder %s598_s17, 2  ;;  %s303_s21 = scalar_lea.sflag [#allocation4], %s302_s19 }
 0x14c   : > { %p424_p3 = pnand %p823_p13, %p822_p7 }
 0x14e   : > { %573 = dma.done.wait (!%p424_p3), %s303_s21, 64  }
 0x14f   : > { %575 = vsyncadd (!%p424_p3), %s303_s21, 4294967232  ;;  %s19_s17 = sadd.s32 1, %s598_s17   ;;  %s824_s12 = smov %s582_s13 }
 0x150   : > { %p16_p6 = scmp.ge.s32.totalorder %s19_s17, 4   ;;  %s825_s13 = smov %s586_s14 }
 0x151   : > { %s826_s14 = smov %s683_s26  ;;  %s827_s15 = smov %s594_s16 }
 0x152   : > { %s828_s16 = smov %s830_s20  ;;  %18 = sbr.rel (!%p16_p6) target bundleno = 6 (0x6), region = 83 }
 0x159   :  { %308 = vsyncpa [#allocation3], 1 }
 0x15a   :  { %310 = vsyncpa [#allocation3 + $0x1], 1 }
 0x15b   :  { %311 = vsyncpa [#allocation4], 1 }
 0x15c   :  { %313 = vsyncpa [#allocation4 + $0x1], 1 }

</bundles_post_ra>
